<compile_context>
chip_gen: v6e
topology: v6e:2x2x1
jax: 0.10.0
libtpu: 0.0.40
codegen_flags: <defaults>
</compile_context>

<pallas_src>
import jax
import jax.numpy as jnp
from jax.experimental import pallas as pl
from jax.experimental.pallas import tpu as pltpu


def _g(x):
    """Piecewise spectral band kernel (matches COVLET.g with alpha=beta=2)."""
    x1, x2 = 1.0, 2.0
    # s(x) = -5 + 11x - 6x^2 + x^3 in Horner form.
    s = ((x - 6.0) * x + 11.0) * x - 5.0
    low = jnp.where(x < x1, x * x, 0.0)                     # x1**(-2) == 1
    mid = jnp.where((x >= x1) & (x <= x2), s, 0.0)
    # Safe reciprocal-square: mask the operand *before* the divide so lanes
    # with x <= x2 (including x <= 0) never see a pow/NaN.  The +1e-12 matches
    # torch's (x + 1e-12).pow(-beta) exactly.
    safe = jnp.where(x > x2, x + 1e-12, 1.0)
    inv = 1.0 / safe
    high = jnp.where(x > x2, (x2 * x2) * inv * inv, 0.0)
    return low + mid + high


def covlet_kernel(t_ref, w_ref, f_ref, vt_ref, o_ref, *, eps):
    """One grid step: a block of SB scales fused into a single MXU matmul."""
    i = pl.program_id(0)
    M, N = f_ref.shape
    SB = o_ref.shape[1] // N                     # scales handled this step

    f = f_ref[...]                               # (M, N)
    w = w_ref[...]                               # (1, N)

    # Stacked LHS: rows [s*M:(s+1)*M] = f_hat scaled by the s-th band kernel.
    rows = []
    for s in range(SB):                          # static, small
        ts = jnp.maximum(t_ref[i * SB + s], eps)     # clamp(min=eps), SMEM scalar
        rows.append(f * _g(w * ts))                  # (M, N), lane-broadcast band
    lhs = rows[0] if SB == 1 else jnp.concatenate(rows, axis=0)   # (SB*M, N)

    # One MXU matmul: v_T pushed once, SB*M rows of occupancy, f32 accumulate.
    res = jnp.dot(lhs, vt_ref[...], preferred_element_type=jnp.float32)

    # Scatter back to the concatenated layout: out[:, s*N:(s+1)*N] = res rows.
    # Static, (8,128)-aligned slices on both sides -> unmasked stores.
    for s in range(SB):
        o_ref[:, s * N:(s + 1) * N] = res[s * M:(s + 1) * M, :].astype(o_ref.dtype)


def covlet_forward(f_hat, w, v, t, eps=1e-16, scales_per_block=None):
    """JAX/Pallas equivalent of COVLET.forward (K / power are unused there)."""
    M, N = f_hat.shape
    num_scale = t.shape[0]
    if scales_per_block is None:
        scales_per_block = num_scale             # full fusion: grid = (1,)
    assert num_scale % scales_per_block == 0
    SB = scales_per_block
    grid_len = num_scale // SB

    w_row = w.reshape(1, N).astype(jnp.float32)
    v_T = v.T.astype(jnp.float32)
    t = t.astype(jnp.float32)
    f_hat = f_hat.astype(jnp.float32)

    kernel = lambda *refs: covlet_kernel(*refs, eps=eps)

    return pl.pallas_call(
        kernel,
        out_shape=jax.ShapeDtypeStruct((M, num_scale * N), jnp.float32),
        grid=(grid_len,),
        in_specs=[
            pl.BlockSpec(memory_space=pltpu.SMEM),           # t (scalars)
            pl.BlockSpec((1, N), lambda i: (0, 0)),          # w (row, invariant)
            pl.BlockSpec((M, N), lambda i: (0, 0)),          # f_hat (invariant)
            pl.BlockSpec((N, N), lambda i: (0, 0)),          # v_T (invariant)
        ],
        # One lane-dense (M, SB*N) slab of the concatenated output per step.
        out_specs=pl.BlockSpec((M, SB * N), lambda i: (0, i)),
        compiler_params=pltpu.CompilerParams(
            dimension_semantics=("parallel",)    # shards scale blocks on v7x's 2 TCs
        ),
    )(t, w_row, f_hat, v_T)


def covlet_reference(f_hat, w, v, t, eps=1e-16):
    """Pure-JAX reference mirroring the torch module's forward."""
    t = jnp.maximum(t, eps)
    v_T = v.T
    outs = []
    for i in range(t.shape[0]):
        band = _g(w * t[i])                      # (N,)
        outs.append((f_hat * band[None, :]) @ v_T)
    return jnp.concatenate(outs, axis=1)


if __name__ == "__main__":
    # Small, TPU-aligned shapes: N = 128 spectral components, M = 8 rows of
    # f_hat, num_scale = 4 scales.
    M, N, NUM_SCALE = 8, 128, 4
    POWER = 2  # unused in forward (only h() uses it)

    key = jax.random.PRNGKey(0)
    k_w, k_f, k_k, k_t = jax.random.split(key, 4)

    # Deterministic "eigendecomposition" inputs: eigh of a synthetic PSD matrix.
    R = jax.random.normal(k_w, (N, N), dtype=jnp.float32)
    C = (R @ R.T) / N
    w, v = jnp.linalg.eigh(C)                    # w: (N,), v: (N, N)
    w = w.astype(jnp.float32)
    v = v.astype(jnp.float32)

    f_hat = jax.random.normal(k_f, (M, N), dtype=jnp.float32)

    # Parameters initialized as in __init__ (deterministic via PRNGKey).
    K = jax.random.uniform(k_k, (1,), minval=10.0, maxval=100.0)  # unused in forward
    t = jnp.power(
        10.0, jax.random.uniform(k_t, (NUM_SCALE,), minval=-0.8, maxval=1.3)
    ).astype(jnp.float32)

    out = covlet_forward(f_hat, w, v, t)
    out = jax.block_until_ready(out)

    ref = covlet_reference(f_hat, w, v, t)
    assert out.shape == (M, NUM_SCALE * N)
    assert jnp.allclose(out, ref, rtol=1e-5, atol=1e-5), "mismatch vs reference"

    print("KERNEL_OK")
</pallas_src>

<mosaic_0001>
module attributes {stable_mosaic.version = 11 : i64} {
  func.func @_lambda_(%arg0: i32, %arg1: memref<4xf32, #tpu.memory_space<smem>>, %arg2: memref<1x128xf32, #tpu.memory_space<vmem>>, %arg3: memref<8x128xf32, #tpu.memory_space<vmem>>, %arg4: memref<128x128xf32, #tpu.memory_space<vmem>>, %arg5: memref<8x512xf32, #tpu.memory_space<vmem>>) attributes {dimension_semantics = [#tpu.dimension_semantics<parallel>], iteration_bounds = array<i64: 1>, scalar_prefetch = 0 : i64, scratch_operands = 0 : i64, tpu.core_type = #tpu.core_type<tc>, window_params = [{transform_indices = @transform_0, window_bounds = array<i64: 4>}, {pipeline_mode = #tpu.pipeline_mode<synchronous>, transform_indices = @transform_1, window_bounds = array<i64: 1, 128>}, {pipeline_mode = #tpu.pipeline_mode<synchronous>, transform_indices = @transform_2, window_bounds = array<i64: 8, 128>}, {pipeline_mode = #tpu.pipeline_mode<synchronous>, transform_indices = @transform_3, window_bounds = array<i64: 128, 128>}, {transform_indices = @transform_4, window_bounds = array<i64: 8, 512>}]} {
    %c0 = arith.constant 0 : index
    %c0_0 = arith.constant 0 : index
    %0 = vector.load %arg3[%c0, %c0_0] : memref<8x128xf32, #tpu.memory_space<vmem>>, vector<8x128xf32>
    %c0_1 = arith.constant 0 : index
    %c0_2 = arith.constant 0 : index
    %1 = vector.load %arg2[%c0_1, %c0_2] : memref<1x128xf32, #tpu.memory_space<vmem>>, vector<1x128xf32>
    %c4_i32 = arith.constant 4 : i32
    %2 = arith.muli %arg0, %c4_i32 : i32
    %c0_i32 = arith.constant 0 : i32
    %3 = arith.addi %2, %c0_i32 : i32
    %4 = arith.index_cast %3 : i32 to index
    %5 = memref.load %arg1[%4] : memref<4xf32, #tpu.memory_space<smem>>
    %cst = arith.constant 1.000000e-16 : f32
    %6 = arith.maximumf %5, %cst : f32
    %7 = vector.broadcast %6 : f32 to vector<1x128xf32>
    %8 = arith.mulf %1, %7 : vector<1x128xf32>
    %cst_3 = arith.constant 6.000000e+00 : f32
    %9 = vector.broadcast %cst_3 : f32 to vector<1x128xf32>
    %10 = arith.subf %8, %9 : vector<1x128xf32>
    %11 = arith.mulf %10, %8 : vector<1x128xf32>
    %cst_4 = arith.constant 1.100000e+01 : f32
    %12 = vector.broadcast %cst_4 : f32 to vector<1x128xf32>
    %13 = arith.addf %11, %12 : vector<1x128xf32>
    %14 = arith.mulf %13, %8 : vector<1x128xf32>
    %cst_5 = arith.constant 5.000000e+00 : f32
    %15 = vector.broadcast %cst_5 : f32 to vector<1x128xf32>
    %16 = arith.subf %14, %15 : vector<1x128xf32>
    %cst_6 = arith.constant 1.000000e+00 : f32
    %17 = vector.broadcast %cst_6 : f32 to vector<1x128xf32>
    %18 = arith.cmpf olt, %8, %17 : vector<1x128xf32>
    %19 = arith.mulf %8, %8 : vector<1x128xf32>
    %cst_7 = arith.constant 0.000000e+00 : f32
    %20 = vector.broadcast %cst_7 : f32 to vector<1x128xf32>
    %21 = arith.select %18, %19, %20 : vector<1x128xi1>, vector<1x128xf32>
    %cst_8 = arith.constant 1.000000e+00 : f32
    %22 = vector.broadcast %cst_8 : f32 to vector<1x128xf32>
    %23 = arith.cmpf oge, %8, %22 : vector<1x128xf32>
    %cst_9 = arith.constant 2.000000e+00 : f32
    %24 = vector.broadcast %cst_9 : f32 to vector<1x128xf32>
    %25 = arith.cmpf ole, %8, %24 : vector<1x128xf32>
    %26 = arith.andi %23, %25 : vector<1x128xi1>
    %cst_10 = arith.constant 0.000000e+00 : f32
    %27 = vector.broadcast %cst_10 : f32 to vector<1x128xf32>
    %28 = arith.select %26, %16, %27 : vector<1x128xi1>, vector<1x128xf32>
    %cst_11 = arith.constant 2.000000e+00 : f32
    %29 = vector.broadcast %cst_11 : f32 to vector<1x128xf32>
    %30 = arith.cmpf ogt, %8, %29 : vector<1x128xf32>
    %cst_12 = arith.constant 9.99999996E-13 : f32
    %31 = vector.broadcast %cst_12 : f32 to vector<1x128xf32>
    %32 = arith.addf %8, %31 : vector<1x128xf32>
    %cst_13 = arith.constant 1.000000e+00 : f32
    %33 = vector.broadcast %cst_13 : f32 to vector<1x128xf32>
    %34 = arith.select %30, %32, %33 : vector<1x128xi1>, vector<1x128xf32>
    %cst_14 = arith.constant 1.000000e+00 : f32
    %35 = vector.broadcast %cst_14 : f32 to vector<1x128xf32>
    %36 = arith.divf %35, %34 : vector<1x128xf32>
    %cst_15 = arith.constant 2.000000e+00 : f32
    %37 = vector.broadcast %cst_15 : f32 to vector<1x128xf32>
    %38 = arith.cmpf ogt, %8, %37 : vector<1x128xf32>
    %cst_16 = arith.constant 4.000000e+00 : f32
    %39 = vector.broadcast %cst_16 : f32 to vector<1x128xf32>
    %40 = arith.mulf %39, %36 : vector<1x128xf32>
    %41 = arith.mulf %40, %36 : vector<1x128xf32>
    %cst_17 = arith.constant 0.000000e+00 : f32
    %42 = vector.broadcast %cst_17 : f32 to vector<1x128xf32>
    %43 = arith.select %38, %41, %42 : vector<1x128xi1>, vector<1x128xf32>
    %44 = arith.addf %21, %28 : vector<1x128xf32>
    %45 = arith.addf %44, %43 : vector<1x128xf32>
    %46 = vector.broadcast %45 : vector<1x128xf32> to vector<8x128xf32>
    %47 = arith.mulf %0, %46 : vector<8x128xf32>
    %c4_i32_18 = arith.constant 4 : i32
    %48 = arith.muli %arg0, %c4_i32_18 : i32
    %c1_i32 = arith.constant 1 : i32
    %49 = arith.addi %48, %c1_i32 : i32
    %50 = arith.index_cast %49 : i32 to index
    %51 = memref.load %arg1[%50] : memref<4xf32, #tpu.memory_space<smem>>
    %cst_19 = arith.constant 1.000000e-16 : f32
    %52 = arith.maximumf %51, %cst_19 : f32
    %53 = vector.broadcast %52 : f32 to vector<1x128xf32>
    %54 = arith.mulf %1, %53 : vector<1x128xf32>
    %cst_20 = arith.constant 6.000000e+00 : f32
    %55 = vector.broadcast %cst_20 : f32 to vector<1x128xf32>
    %56 = arith.subf %54, %55 : vector<1x128xf32>
    %57 = arith.mulf %56, %54 : vector<1x128xf32>
    %cst_21 = arith.constant 1.100000e+01 : f32
    %58 = vector.broadcast %cst_21 : f32 to vector<1x128xf32>
    %59 = arith.addf %57, %58 : vector<1x128xf32>
    %60 = arith.mulf %59, %54 : vector<1x128xf32>
    %cst_22 = arith.constant 5.000000e+00 : f32
    %61 = vector.broadcast %cst_22 : f32 to vector<1x128xf32>
    %62 = arith.subf %60, %61 : vector<1x128xf32>
    %cst_23 = arith.constant 1.000000e+00 : f32
    %63 = vector.broadcast %cst_23 : f32 to vector<1x128xf32>
    %64 = arith.cmpf olt, %54, %63 : vector<1x128xf32>
    %65 = arith.mulf %54, %54 : vector<1x128xf32>
    %cst_24 = arith.constant 0.000000e+00 : f32
    %66 = vector.broadcast %cst_24 : f32 to vector<1x128xf32>
    %67 = arith.select %64, %65, %66 : vector<1x128xi1>, vector<1x128xf32>
    %cst_25 = arith.constant 1.000000e+00 : f32
    %68 = vector.broadcast %cst_25 : f32 to vector<1x128xf32>
    %69 = arith.cmpf oge, %54, %68 : vector<1x128xf32>
    %cst_26 = arith.constant 2.000000e+00 : f32
    %70 = vector.broadcast %cst_26 : f32 to vector<1x128xf32>
    %71 = arith.cmpf ole, %54, %70 : vector<1x128xf32>
    %72 = arith.andi %69, %71 : vector<1x128xi1>
    %cst_27 = arith.constant 0.000000e+00 : f32
    %73 = vector.broadcast %cst_27 : f32 to vector<1x128xf32>
    %74 = arith.select %72, %62, %73 : vector<1x128xi1>, vector<1x128xf32>
    %cst_28 = arith.constant 2.000000e+00 : f32
    %75 = vector.broadcast %cst_28 : f32 to vector<1x128xf32>
    %76 = arith.cmpf ogt, %54, %75 : vector<1x128xf32>
    %cst_29 = arith.constant 9.99999996E-13 : f32
    %77 = vector.broadcast %cst_29 : f32 to vector<1x128xf32>
    %78 = arith.addf %54, %77 : vector<1x128xf32>
    %cst_30 = arith.constant 1.000000e+00 : f32
    %79 = vector.broadcast %cst_30 : f32 to vector<1x128xf32>
    %80 = arith.select %76, %78, %79 : vector<1x128xi1>, vector<1x128xf32>
    %cst_31 = arith.constant 1.000000e+00 : f32
    %81 = vector.broadcast %cst_31 : f32 to vector<1x128xf32>
    %82 = arith.divf %81, %80 : vector<1x128xf32>
    %cst_32 = arith.constant 2.000000e+00 : f32
    %83 = vector.broadcast %cst_32 : f32 to vector<1x128xf32>
    %84 = arith.cmpf ogt, %54, %83 : vector<1x128xf32>
    %cst_33 = arith.constant 4.000000e+00 : f32
    %85 = vector.broadcast %cst_33 : f32 to vector<1x128xf32>
    %86 = arith.mulf %85, %82 : vector<1x128xf32>
    %87 = arith.mulf %86, %82 : vector<1x128xf32>
    %cst_34 = arith.constant 0.000000e+00 : f32
    %88 = vector.broadcast %cst_34 : f32 to vector<1x128xf32>
    %89 = arith.select %84, %87, %88 : vector<1x128xi1>, vector<1x128xf32>
    %90 = arith.addf %67, %74 : vector<1x128xf32>
    %91 = arith.addf %90, %89 : vector<1x128xf32>
    %92 = vector.broadcast %91 : vector<1x128xf32> to vector<8x128xf32>
    %93 = arith.mulf %0, %92 : vector<8x128xf32>
    %c4_i32_35 = arith.constant 4 : i32
    %94 = arith.muli %arg0, %c4_i32_35 : i32
    %c2_i32 = arith.constant 2 : i32
    %95 = arith.addi %94, %c2_i32 : i32
    %96 = arith.index_cast %95 : i32 to index
    %97 = memref.load %arg1[%96] : memref<4xf32, #tpu.memory_space<smem>>
    %cst_36 = arith.constant 1.000000e-16 : f32
    %98 = arith.maximumf %97, %cst_36 : f32
    %99 = vector.broadcast %98 : f32 to vector<1x128xf32>
    %100 = arith.mulf %1, %99 : vector<1x128xf32>
    %cst_37 = arith.constant 6.000000e+00 : f32
    %101 = vector.broadcast %cst_37 : f32 to vector<1x128xf32>
    %102 = arith.subf %100, %101 : vector<1x128xf32>
    %103 = arith.mulf %102, %100 : vector<1x128xf32>
    %cst_38 = arith.constant 1.100000e+01 : f32
    %104 = vector.broadcast %cst_38 : f32 to vector<1x128xf32>
    %105 = arith.addf %103, %104 : vector<1x128xf32>
    %106 = arith.mulf %105, %100 : vector<1x128xf32>
    %cst_39 = arith.constant 5.000000e+00 : f32
    %107 = vector.broadcast %cst_39 : f32 to vector<1x128xf32>
    %108 = arith.subf %106, %107 : vector<1x128xf32>
    %cst_40 = arith.constant 1.000000e+00 : f32
    %109 = vector.broadcast %cst_40 : f32 to vector<1x128xf32>
    %110 = arith.cmpf olt, %100, %109 : vector<1x128xf32>
    %111 = arith.mulf %100, %100 : vector<1x128xf32>
    %cst_41 = arith.constant 0.000000e+00 : f32
    %112 = vector.broadcast %cst_41 : f32 to vector<1x128xf32>
    %113 = arith.select %110, %111, %112 : vector<1x128xi1>, vector<1x128xf32>
    %cst_42 = arith.constant 1.000000e+00 : f32
    %114 = vector.broadcast %cst_42 : f32 to vector<1x128xf32>
    %115 = arith.cmpf oge, %100, %114 : vector<1x128xf32>
    %cst_43 = arith.constant 2.000000e+00 : f32
    %116 = vector.broadcast %cst_43 : f32 to vector<1x128xf32>
    %117 = arith.cmpf ole, %100, %116 : vector<1x128xf32>
    %118 = arith.andi %115, %117 : vector<1x128xi1>
    %cst_44 = arith.constant 0.000000e+00 : f32
    %119 = vector.broadcast %cst_44 : f32 to vector<1x128xf32>
    %120 = arith.select %118, %108, %119 : vector<1x128xi1>, vector<1x128xf32>
    %cst_45 = arith.constant 2.000000e+00 : f32
    %121 = vector.broadcast %cst_45 : f32 to vector<1x128xf32>
    %122 = arith.cmpf ogt, %100, %121 : vector<1x128xf32>
    %cst_46 = arith.constant 9.99999996E-13 : f32
    %123 = vector.broadcast %cst_46 : f32 to vector<1x128xf32>
    %124 = arith.addf %100, %123 : vector<1x128xf32>
    %cst_47 = arith.constant 1.000000e+00 : f32
    %125 = vector.broadcast %cst_47 : f32 to vector<1x128xf32>
    %126 = arith.select %122, %124, %125 : vector<1x128xi1>, vector<1x128xf32>
    %cst_48 = arith.constant 1.000000e+00 : f32
    %127 = vector.broadcast %cst_48 : f32 to vector<1x128xf32>
    %128 = arith.divf %127, %126 : vector<1x128xf32>
    %cst_49 = arith.constant 2.000000e+00 : f32
    %129 = vector.broadcast %cst_49 : f32 to vector<1x128xf32>
    %130 = arith.cmpf ogt, %100, %129 : vector<1x128xf32>
    %cst_50 = arith.constant 4.000000e+00 : f32
    %131 = vector.broadcast %cst_50 : f32 to vector<1x128xf32>
    %132 = arith.mulf %131, %128 : vector<1x128xf32>
    %133 = arith.mulf %132, %128 : vector<1x128xf32>
    %cst_51 = arith.constant 0.000000e+00 : f32
    %134 = vector.broadcast %cst_51 : f32 to vector<1x128xf32>
    %135 = arith.select %130, %133, %134 : vector<1x128xi1>, vector<1x128xf32>
    %136 = arith.addf %113, %120 : vector<1x128xf32>
    %137 = arith.addf %136, %135 : vector<1x128xf32>
    %138 = vector.broadcast %137 : vector<1x128xf32> to vector<8x128xf32>
    %139 = arith.mulf %0, %138 : vector<8x128xf32>
    %c4_i32_52 = arith.constant 4 : i32
    %140 = arith.muli %arg0, %c4_i32_52 : i32
    %c3_i32 = arith.constant 3 : i32
    %141 = arith.addi %140, %c3_i32 : i32
    %142 = arith.index_cast %141 : i32 to index
    %143 = memref.load %arg1[%142] : memref<4xf32, #tpu.memory_space<smem>>
    %cst_53 = arith.constant 1.000000e-16 : f32
    %144 = arith.maximumf %143, %cst_53 : f32
    %145 = vector.broadcast %144 : f32 to vector<1x128xf32>
    %146 = arith.mulf %1, %145 : vector<1x128xf32>
    %cst_54 = arith.constant 6.000000e+00 : f32
    %147 = vector.broadcast %cst_54 : f32 to vector<1x128xf32>
    %148 = arith.subf %146, %147 : vector<1x128xf32>
    %149 = arith.mulf %148, %146 : vector<1x128xf32>
    %cst_55 = arith.constant 1.100000e+01 : f32
    %150 = vector.broadcast %cst_55 : f32 to vector<1x128xf32>
    %151 = arith.addf %149, %150 : vector<1x128xf32>
    %152 = arith.mulf %151, %146 : vector<1x128xf32>
    %cst_56 = arith.constant 5.000000e+00 : f32
    %153 = vector.broadcast %cst_56 : f32 to vector<1x128xf32>
    %154 = arith.subf %152, %153 : vector<1x128xf32>
    %cst_57 = arith.constant 1.000000e+00 : f32
    %155 = vector.broadcast %cst_57 : f32 to vector<1x128xf32>
    %156 = arith.cmpf olt, %146, %155 : vector<1x128xf32>
    %157 = arith.mulf %146, %146 : vector<1x128xf32>
    %cst_58 = arith.constant 0.000000e+00 : f32
    %158 = vector.broadcast %cst_58 : f32 to vector<1x128xf32>
    %159 = arith.select %156, %157, %158 : vector<1x128xi1>, vector<1x128xf32>
    %cst_59 = arith.constant 1.000000e+00 : f32
    %160 = vector.broadcast %cst_59 : f32 to vector<1x128xf32>
    %161 = arith.cmpf oge, %146, %160 : vector<1x128xf32>
    %cst_60 = arith.constant 2.000000e+00 : f32
    %162 = vector.broadcast %cst_60 : f32 to vector<1x128xf32>
    %163 = arith.cmpf ole, %146, %162 : vector<1x128xf32>
    %164 = arith.andi %161, %163 : vector<1x128xi1>
    %cst_61 = arith.constant 0.000000e+00 : f32
    %165 = vector.broadcast %cst_61 : f32 to vector<1x128xf32>
    %166 = arith.select %164, %154, %165 : vector<1x128xi1>, vector<1x128xf32>
    %cst_62 = arith.constant 2.000000e+00 : f32
    %167 = vector.broadcast %cst_62 : f32 to vector<1x128xf32>
    %168 = arith.cmpf ogt, %146, %167 : vector<1x128xf32>
    %cst_63 = arith.constant 9.99999996E-13 : f32
    %169 = vector.broadcast %cst_63 : f32 to vector<1x128xf32>
    %170 = arith.addf %146, %169 : vector<1x128xf32>
    %cst_64 = arith.constant 1.000000e+00 : f32
    %171 = vector.broadcast %cst_64 : f32 to vector<1x128xf32>
    %172 = arith.select %168, %170, %171 : vector<1x128xi1>, vector<1x128xf32>
    %cst_65 = arith.constant 1.000000e+00 : f32
    %173 = vector.broadcast %cst_65 : f32 to vector<1x128xf32>
    %174 = arith.divf %173, %172 : vector<1x128xf32>
    %cst_66 = arith.constant 2.000000e+00 : f32
    %175 = vector.broadcast %cst_66 : f32 to vector<1x128xf32>
    %176 = arith.cmpf ogt, %146, %175 : vector<1x128xf32>
    %cst_67 = arith.constant 4.000000e+00 : f32
    %177 = vector.broadcast %cst_67 : f32 to vector<1x128xf32>
    %178 = arith.mulf %177, %174 : vector<1x128xf32>
    %179 = arith.mulf %178, %174 : vector<1x128xf32>
    %cst_68 = arith.constant 0.000000e+00 : f32
    %180 = vector.broadcast %cst_68 : f32 to vector<1x128xf32>
    %181 = arith.select %176, %179, %180 : vector<1x128xi1>, vector<1x128xf32>
    %182 = arith.addf %159, %166 : vector<1x128xf32>
    %183 = arith.addf %182, %181 : vector<1x128xf32>
    %184 = vector.broadcast %183 : vector<1x128xf32> to vector<8x128xf32>
    %185 = arith.mulf %0, %184 : vector<8x128xf32>
    %186 = tpu.concatenate %47, %93, %139, %185 in 0 : vector<8x128xf32>, vector<8x128xf32>, vector<8x128xf32>, vector<8x128xf32> -> vector<32x128xf32>
    %c0_69 = arith.constant 0 : index
    %c0_70 = arith.constant 0 : index
    %187 = vector.load %arg4[%c0_69, %c0_70] : memref<128x128xf32, #tpu.memory_space<vmem>>, vector<128x128xf32>
    %cst_71 = arith.constant dense<0.000000e+00> : vector<32x128xf32>
    %188 = tpu.matmul %186, %187, %cst_71 {dimension_numbers = #tpu.dot_dimension_numbers<[1], [0], [0], [1], [0, 0, 1, 1], [], []>} : vector<32x128xf32>, vector<128x128xf32>, vector<32x128xf32> -> vector<32x128xf32>
    %189 = vector.extract_strided_slice %188 {offsets = [0, 0], sizes = [8, 128], strides = [1, 1]} : vector<32x128xf32> to vector<8x128xf32>
    %c0_72 = arith.constant 0 : index
    %c0_73 = arith.constant 0 : index
    %190 = vector.load %arg5[%c0_72, %c0_73] : memref<8x512xf32, #tpu.memory_space<vmem>>, vector<8x128xf32>
    tpu.vector_store %arg5[%c0_72, %c0_73], %189 {strides = array<i32>} : memref<8x512xf32, #tpu.memory_space<vmem>>, vector<8x128xf32>,
    %191 = vector.extract_strided_slice %188 {offsets = [8, 0], sizes = [8, 128], strides = [1, 1]} : vector<32x128xf32> to vector<8x128xf32>
    %c0_74 = arith.constant 0 : index
    %c128 = arith.constant 128 : index
    %192 = vector.load %arg5[%c0_74, %c128] : memref<8x512xf32, #tpu.memory_space<vmem>>, vector<8x128xf32>
    tpu.vector_store %arg5[%c0_74, %c128], %191 {strides = array<i32>} : memref<8x512xf32, #tpu.memory_space<vmem>>, vector<8x128xf32>,
    %193 = vector.extract_strided_slice %188 {offsets = [16, 0], sizes = [8, 128], strides = [1, 1]} : vector<32x128xf32> to vector<8x128xf32>
    %c0_75 = arith.constant 0 : index
    %c256 = arith.constant 256 : index
    %194 = vector.load %arg5[%c0_75, %c256] : memref<8x512xf32, #tpu.memory_space<vmem>>, vector<8x128xf32>
    tpu.vector_store %arg5[%c0_75, %c256], %193 {strides = array<i32>} : memref<8x512xf32, #tpu.memory_space<vmem>>, vector<8x128xf32>,
    %195 = vector.extract_strided_slice %188 {offsets = [24, 0], sizes = [8, 128], strides = [1, 1]} : vector<32x128xf32> to vector<8x128xf32>
    %c0_76 = arith.constant 0 : index
    %c384 = arith.constant 384 : index
    %196 = vector.load %arg5[%c0_76, %c384] : memref<8x512xf32, #tpu.memory_space<vmem>>, vector<8x128xf32>
    tpu.vector_store %arg5[%c0_76, %c384], %195 {strides = array<i32>} : memref<8x512xf32, #tpu.memory_space<vmem>>, vector<8x128xf32>,
    return
  }
  func.func @transform_0(%arg0: i32) -> i32 {
    %c0_i32 = arith.constant 0 : i32
    %c0_i32_0 = arith.constant 0 : i32
    return %c0_i32 : i32
  }
  func.func @transform_1(%arg0: i32) -> (i32, i32) {
    %c0_i32 = arith.constant 0 : i32
    %c0_i32_0 = arith.constant 0 : i32
    %c0_i32_1 = arith.constant 0 : i32
    return %c0_i32, %c0_i32_0 : i32, i32
  }
  func.func @transform_2(%arg0: i32) -> (i32, i32) {
    %c0_i32 = arith.constant 0 : i32
    %c0_i32_0 = arith.constant 0 : i32
    %c0_i32_1 = arith.constant 0 : i32
    return %c0_i32, %c0_i32_0 : i32, i32
  }
  func.func @transform_3(%arg0: i32) -> (i32, i32) {
    %c0_i32 = arith.constant 0 : i32
    %c0_i32_0 = arith.constant 0 : i32
    %c0_i32_1 = arith.constant 0 : i32
    return %c0_i32, %c0_i32_0 : i32, i32
  }
  func.func @transform_4(%arg0: i32) -> (i32, i32) {
    %c0_i32 = arith.constant 0 : i32
    %c0_i32_0 = arith.constant 0 : i32
    return %c0_i32, %arg0 : i32, i32
  }
}

</mosaic_0001>

<bundles_post_ra>
// kernel: tpu_custom_call.1
= control target key start
LH: loop header
LB: loop body
LE: loop exit
PB: predicated region body
PF: predicated region fallthrough
CT: control target
= control target key end

     0   :  { %9 = vsyncpa [#allocation5], 0  ;;  %s665_s0 = inlined_call_operand.hbm [shape: f32[4], index: 0, kind: input, shape index: {}]   ;;  %s666_s1 = inlined_call_operand.vmem [shape: f32[1,128], index: 1, kind: input, shape index: {}]   ;;  %s667_s2 = inlined_call_operand.hbm [shape: f32[8,128], index: 2, kind: input, shape index: {}]   ;;  %s668_s3 = inlined_call_operand.hbm [shape: f32[128,128], index: 3, kind: input, shape index: {}]   ;;  %s669_s4 = inlined_call_operand.hbm [shape: f32[8,512], index: 4, kind: output, shape index: {}]  }
   0x1   :  { %10 = vsyncpa [#allocation3], 0 }
   0x2   :  { %11 = vsyncpa [#allocation8], 0 }
   0x3   :  { %12 = vsyncpa [#allocation4], 0  ;;  %s507_s15 = smov [#allocation2]   ;;  %s508_s18 = smov [#allocation6]  }
   0x4   :  { %20 = dma.hbm_to_smem %s665_s0, 16, %s507_s15, [#allocation5]  }
   0x5   :  { %s29_s19 = sshll.u32 %s508_s18, 4  ;;  %s509_s20 = smov [#allocation7]   ;;  %s30_s19 = int_to_ptr.vmem [resolvable:$true] %s29_s19 }
   0x6   :  { %s38_s21 = sshll.u32 %s509_s20, 4  ;;  %s447_s22 = scalar_lea.vmem %s30_s19, 128  ;;  %s39_s21 = int_to_ptr.vmem [resolvable:$true] %s38_s21 }
   0x7   :  { %p448_p0 = scmp.ne.s32.totalorder %s30_s19, %s447_s22  ;;  %p452_p1 = scmp.lt.s32.totalorder %s30_s19, %s30_s19 }
   0x8   :  { %p453_p2 = scmp.lt.s32.totalorder %s447_s22, %s447_s22 }
   0xa   :  { %p454_p3 = por %p453_p2, %p452_p1 }
   0xc   :  { %p455_p4 = pnand %p454_p3, %p448_p0 }
   0xe   :  { %458 = shalt.err (!%p455_p4)
}
   0xf   :  { %32 = dma.hbm_to_vmem [thread:$0]  %s667_s2, 128, %s30_s19, [#allocation3]  }
  0x10   :  { %s467_s25 = scalar_lea.vmem %s39_s21, 2048  ;;  %p472_p6 = scmp.lt.s32.totalorder %s39_s21, %s39_s21 }
  0x11   :  { %p468_p5 = scmp.ne.s32.totalorder %s39_s21, %s467_s25  ;;  %p473_p7 = scmp.lt.s32.totalorder %s467_s25, %s467_s25 }
  0x13   :  { %p474_p8 = por %p473_p7, %p472_p6 }
  0x15   :  { %p475_p9 = pnand %p474_p8, %p468_p5 }
  0x17   :  { %478 = shalt.err (!%p475_p9)
}
  0x18   :  { %s510_s0 = smov 128   ;;  %s511_s26 = smov 8  }
  0x19   :  { %44 = dma.hbm_to_vmem [thread:$0]  %s668_s3, 2048, %s39_s21, [#allocation8], %s510_s0, %s510_s0, %s511_s26  }
  0x1a   :  { %499 = dma.done.wait [#allocation5], 16  }
  0x1b   :  { %500 = vsyncadd [#allocation5], 4294967280 }
  0x1c   :  { %501 = dma.done.wait [#allocation3], 128  }
  0x1d   :  { %502 = vsyncadd [#allocation3], 4294967168 }
  0x1e   :  { %503 = dma.done.wait [#allocation8], 2048  }
  0x1f   :  { %504 = vsyncadd [#allocation8], 4294965248 }
  0x20   :  { %54 = sfence }
  0x21   :  { %v208_v0 = vld [vmem:[#allocation7 + $0x78] sm:$0xff]  ;;  %v207_v1 = vld [vmem:[#allocation7 + $0x70] sm:$0xff]  ;;  %s58_s2 = sld [smem:[#allocation2]]  ;;  %v206_v2 = vld [vmem:[#allocation7 + $0x68] sm:$0xff]  ;;  %s512_s7 = smov 1e-16   ;;  %v85_v42 = vlaneseq }
  0x22   :  { %346 = vmatprep.subr.mxu0 %v208_v0  ;;  %384 = vmatprep.subr.mxu1 %v208_v0  ;;  %s320_s29 = sld [smem:[#allocation2 + $0x2]]  ;;  %v205_v3 = vld [vmem:[#allocation7 + $0x60] sm:$0xff]  ;;  %v551_v4 = vld [vmem:[%s666_s1] sm:$0x1]  ;;  %v203_v7 = vld [vmem:[#allocation7 + $0x50] sm:$0xff]  ;;  %s513_s11 = smov [#allocation9]  }
  0x23   :  { %347 = vmatpush3.msra.mxu0 %v208_v0  ;;  %400 = vmatpush3.msra.mxu1 %v208_v0  ;;  %s317_s30 = sld [smem:[#allocation2 + $0x1]]  ;;  %v204_v5 = vld [vmem:[#allocation7 + $0x58] sm:$0xff]  ;;  %v202_v10 = vld [vmem:[#allocation7 + $0x48] sm:$0xff]  ;;  %v201_v14 = vld [vmem:[#allocation7 + $0x40] sm:$0xff]  ;;  %v86_v53 = vshrl.u32 %v85_v42, 7  ;;  %s304_s12 = sshll.u32 %s513_s11, 4  ;;  %s305_s12 = int_to_ptr.vmem [resolvable:$true] %s304_s12 }
  0x24   :  { %348 = vmatprep.subr.mxu0 %v207_v1  ;;  %385 = vmatprep.subr.mxu1 %v207_v1  ;;  %s553_s6 = sld [smem:[#allocation2 + $0x3]]  ;;  %v200_v19 = vld [vmem:[#allocation7 + $0x38] sm:$0xff]  ;;  %v199_v23 = vld [vmem:[#allocation7 + $0x30] sm:$0xff]  ;;  %v198_v27 = vld [vmem:[#allocation7 + $0x28] sm:$0xff]  ;;  %s479_s13 = scalar_lea.vmem %s305_s12, 512 }
  0x25   :  { %349 = vmatpush3.msra.mxu0 %v207_v1  ;;  %401 = vmatpush3.msra.mxu1 %v207_v1  ;;  %v197_v32 = vld [vmem:[#allocation7 + $0x20] sm:$0xff]  ;;  %v196_v36 = vld [vmem:[#allocation7 + $0x18] sm:$0xff]  ;;  %v195_v44 = vld [vmem:[#allocation7 + $0x10] sm:$0xff]  ;;  %v87_v1 = vsub.s32 0, %v86_v53  ;;  %p480_p10 = scmp.ne.s32.totalorder %s305_s12, %s479_s13  ;;  %p484_p11 = scmp.lt.s32.totalorder %s305_s12, %s305_s12 }
  0x26   :  { %350 = vmatprep.subr.mxu0 %v206_v2  ;;  %386 = vmatprep.subr.mxu1 %v206_v2  ;;  %v194_v47 = vld [vmem:[#allocation7 + $0x8] sm:$0xff]  ;;  %v193_v57 = vld [vmem:[#allocation7] sm:$0xff]  ;;  %p485_p12 = scmp.lt.s32.totalorder %s479_s13, %s479_s13 }
  0x27   :  { %351 = vmatpush3.msra.mxu0 %v206_v2  ;;  %402 = vmatpush3.msra.mxu1 %v206_v2  ;;  %s59_s8 = smax.f32 %s512_s7, %s58_s2 }
  0x28   :  { %352 = vmatprep.subr.mxu0 %v205_v3  ;;  %387 = vmatprep.subr.mxu1 %v205_v3  ;;  %v60_v6 = vstv %s59_s8  ;;  %s127_s1 = smax.f32 %s512_s7, %s320_s29  ;;  %p486_p13 = por %p485_p12, %p484_p11 }
  0x29   :  { %353 = vmatpush3.msra.mxu0 %v205_v3  ;;  %403 = vmatpush3.msra.mxu1 %v205_v3  ;;  %v557_v8 = vmul.f32 %v60_v6, %v551_v4  ;;  %v128_v9 = vstv %s127_s1  ;;  %s93_s9 = smax.f32 %s512_s7, %s317_s30 }
  0x2a   :  { %354 = vmatprep.subr.mxu0 %v204_v5  ;;  %388 = vmatprep.subr.mxu1 %v204_v5  ;;  %v565_v13 = vmul.f32 %v128_v9, %v551_v4  ;;  %v94_v18 = vstv %s93_s9  ;;  %s161_s10 = smax.f32 %s512_s7, %s553_s6  ;;  %p487_p0 = pnand %p486_p13, %p480_p10 }
  0x2b   :  { %355 = vmatpush3.msra.mxu0 %v204_v5  ;;  %404 = vmatpush3.msra.mxu1 %v204_v5  ;;  %v315_v11 = vadd.f32 -6.0, %v557_v8  ;;  %vm74_vm0 = vcmp.gt.f32.partialorder %v557_v8, 2.0  ;;  %v75_v12 = vadd.f32 1e-12, %v557_v8  ;;  %v577_v24 = vmul.f32 %v94_v18, %v551_v4 }
  0x2c   :  { %356 = vmatprep.subr.mxu0 %v203_v7  ;;  %389 = vmatprep.subr.mxu1 %v203_v7  ;;  %v321_v17 = vadd.f32 -6.0, %v565_v13  ;;  %vm142_vm1 = vcmp.gt.f32.partialorder %v565_v13, 2.0  ;;  %v143_v22 = vadd.f32 1e-12, %v565_v13  ;;  %v162_v25 = vstv %s161_s10 }
  0x2d   :  { %357 = vmatpush3.msra.mxu0 %v203_v7  ;;  %405 = vmatpush3.msra.mxu1 %v203_v7  ;;  %v63_v15 = vmul.f32 %v315_v11, %v557_v8  ;;  %v76_v16 = vsel %vm74_vm0, %v75_v12, 1.0  ;;  %v318_v30 = vadd.f32 -6.0, %v577_v24  ;;  %vm70_vm2 = vcmp.ge.f32.partialorder %v557_v8, 1.0  ;;  %v55_v11 = vld [vmem:[#allocation6] sm:$0xff] }
  0x2e   :  { %358 = vmatprep.subr.mxu0 %v202_v10  ;;  %390 = vmatprep.subr.mxu1 %v202_v10  ;;  %423 = vrcp.f32 %v76_v16  ;;  %v131_v21 = vmul.f32 %v321_v17, %v565_v13  ;;  %v144_v26 = vsel %vm142_vm1, %v143_v22, 1.0  ;;  %v585_v31 = vmul.f32 %v162_v25, %v551_v4 }
  0x2f   :  { %359 = vmatpush3.msra.mxu0 %v202_v10  ;;  %406 = vmatpush3.msra.mxu1 %v202_v10  ;;  %v64_v20 = vadd.f32 11.0, %v63_v15  ;;  %425 = vrcp.f32 %v144_v26  ;;  %vm71_vm3 = vcmp.le.f32.partialorder %v557_v8, 2.0  ;;  %v97_v33 = vmul.f32 %v318_v30, %v577_v24 }
  0x30   :  { %360 = vmatprep.subr.mxu0 %v201_v14  ;;  %391 = vmatprep.subr.mxu1 %v201_v14  ;;  %v132_v29 = vadd.f32 11.0, %v131_v21  ;;  %vm108_vm4 = vcmp.gt.f32.partialorder %v577_v24, 2.0  ;;  %v109_v34 = vadd.f32 1e-12, %v577_v24  ;;  %v324_v35 = vadd.f32 -6.0, %v585_v31  ;;  %vm602_vm6 = vmand %vm70_vm2, %vm71_vm3 }
  0x31   :  { %361 = vmatpush3.msra.mxu0 %v201_v14  ;;  %407 = vmatpush3.msra.mxu1 %v201_v14  ;;  %v65_v28 = vmul.f32 %v64_v20, %v557_v8  ;;  %v68_v38 = vmul.f32 %v557_v8, %v557_v8  ;;  %vm67_vm5 = vcmp.lt.f32.partialorder %v557_v8, 1.0  ;;  %v98_v43 = vadd.f32 11.0, %v97_v33 }
  0x32   :  { %362 = vmatprep.subr.mxu0 %v200_v19  ;;  %392 = vmatprep.subr.mxu1 %v200_v19  ;;  %v133_v39 = vmul.f32 %v132_v29, %v565_v13  ;;  %v110_v40 = vsel %vm108_vm4, %v109_v34, 1.0  ;;  %vm138_vm7 = vcmp.ge.f32.partialorder %v565_v13, 1.0  ;;  %vm139_vm8 = vcmp.le.f32.partialorder %v565_v13, 2.0 }
  0x33   :  { %363 = vmatpush3.msra.mxu0 %v200_v19  ;;  %408 = vmatpush3.msra.mxu1 %v200_v19  ;;  %v316_v37 = vadd.f32 -5.0, %v65_v28  ;;  %427 = vrcp.f32 %v110_v40  ;;  %v165_v45 = vmul.f32 %v324_v35, %v585_v31  ;;  %vm176_vm9 = vcmp.gt.f32.partialorder %v585_v31, 2.0  ;;  %vm622_vm11 = vmand %vm138_vm7, %vm139_vm8 }
  0x34   :  { %364 = vmatprep.subr.mxu0 %v199_v23  ;;  %393 = vmatprep.subr.mxu1 %v199_v23  ;;  %v177_v46 = vadd.f32 1e-12, %v585_v31  ;;  %v69_v48 = vsel %vm67_vm5, %v68_v38, 0.0  ;;  %v322_v50 = vadd.f32 -5.0, %v133_v39  ;;  %v136_v51 = vmul.f32 %v565_v13, %v565_v13 }
  0x35   :  { %365 = vmatpush3.msra.mxu0 %v199_v23  ;;  %409 = vmatpush3.msra.mxu1 %v199_v23  ;;  %v73_v49 = vsel %vm602_vm6, %v316_v37, 0.0  ;;  %vm135_vm10 = vcmp.lt.f32.partialorder %v565_v13, 1.0  ;;  %v99_v55 = vmul.f32 %v98_v43, %v577_v24  ;;  %v166_v59 = vadd.f32 11.0, %v165_v45 }
  0x36   :  { %366 = vmatprep.subr.mxu0 %v198_v27  ;;  %394 = vmatprep.subr.mxu1 %v198_v27  ;;  %v178_v56 = vsel %vm176_vm9, %v177_v46, 1.0  ;;  %v82_v60 = vadd.f32 %v73_v49, %v69_v48  ;;  %vm104_vm12 = vcmp.ge.f32.partialorder %v577_v24, 1.0  ;;  %vm105_vm13 = vcmp.le.f32.partialorder %v577_v24, 2.0 }
  0x37   :  { %367 = vmatpush3.msra.mxu0 %v198_v27  ;;  %410 = vmatpush3.msra.mxu1 %v198_v27  ;;  %429 = vrcp.f32 %v178_v56  ;;  %v137_v62 = vsel %vm135_vm10, %v136_v51, 0.0  ;;  %v141_v63 = vsel %vm622_vm11, %v322_v50, 0.0  ;;  %v319_v2 = vadd.f32 -5.0, %v99_v55  ;;  %vm644_vm15 = vmand %vm104_vm12, %vm105_vm13 }
  0x38   :  { %368 = vmatprep.subr.mxu0 %v197_v32  ;;  %395 = vmatprep.subr.mxu1 %v197_v32  ;;  %v102_v3 = vmul.f32 %v577_v24, %v577_v24  ;;  %vm101_vm14 = vcmp.lt.f32.partialorder %v577_v24, 1.0  ;;  %v167_v7 = vmul.f32 %v166_v59, %v585_v31  ;;  %v150_v10 = vadd.f32 %v141_v63, %v137_v62 }
  0x39   :  { %369 = vmatpush3.msra.mxu0 %v197_v32  ;;  %411 = vmatpush3.msra.mxu1 %v197_v32  ;;  %vm172_vm2 = vcmp.ge.f32.partialorder %v585_v31, 1.0  ;;  %v107_v15 = vsel %vm644_vm15, %v319_v2, 0.0  ;;  %v170_v19 = vmul.f32 %v585_v31, %v585_v31  ;;  %vm169_vm3 = vcmp.lt.f32.partialorder %v585_v31, 1.0 }
  0x3a   :  { %370 = vmatprep.subr.mxu0 %v196_v36  ;;  %396 = vmatprep.subr.mxu1 %v196_v36  ;;  %v103_v14 = vsel %vm101_vm14, %v102_v3, 0.0  ;;  %v325_v18 = vadd.f32 -5.0, %v167_v7 }
  0x3b   :  { %371 = vmatpush3.msra.mxu0 %v196_v36  ;;  %412 = vmatpush3.msra.mxu1 %v196_v36  ;;  %v424_v52 = vpop.eup %423  ;;  %v116_v23 = vadd.f32 %v107_v15, %v103_v14  ;;  %v171_v27 = vsel %vm169_vm3, %v170_v19, 0.0 }
  0x3c   :  { %372 = vmatprep.subr.mxu0 %v195_v44  ;;  %397 = vmatprep.subr.mxu1 %v195_v44  ;;  %v79_v58 = vmul.f32 4.0, %v424_v52  ;;  %v426_v0 = vpop.eup %425 }
  0x3d   :  { %373 = vmatpush3.msra.mxu0 %v195_v44  ;;  %413 = vmatpush3.msra.mxu1 %v195_v44  ;;  %v147_v5 = vmul.f32 4.0, %v426_v0 }
  0x3e   :  { %374 = vmatprep.subr.mxu0 %v194_v47  ;;  %398 = vmatprep.subr.mxu1 %v194_v47  ;;  %v80_v61 = vmul.f32 %v424_v52, %v79_v58 }
  0x3f   :  { %375 = vmatpush3.msra.mxu0 %v194_v47  ;;  %414 = vmatpush3.msra.mxu1 %v194_v47  ;;  %v148_v12 = vmul.f32 %v426_v0, %v147_v5 }
  0x40   :  { %376 = vmatprep.subr.mxu0 %v193_v57  ;;  %399 = vmatprep.subr.mxu1 %v193_v57  ;;  %v81_v4 = vsel %vm74_vm0, %v80_v61, 0.0  ;;  %vm173_vm0 = vcmp.le.f32.partialorder %v585_v31, 2.0  ;;  %v428_v16 = vpop.eup %427 }
  0x41   :  { %377 = vmatpush3.msra.mxu0 %v193_v57  ;;  %415 = vmatpush3.msra.mxu1 %v193_v57  ;;  %v83_v9 = vadd.f32 %v82_v60, %v81_v4  ;;  %v149_v17 = vsel %vm142_vm1, %v148_v12, 0.0  ;;  %v113_v22 = vmul.f32 4.0, %v428_v16  ;;  %vm174_vm5 = vmand %vm172_vm2, %vm173_vm0 }
  0x42   :  { %v151_v21 = vadd.f32 %v150_v10, %v149_v17  ;;  %v175_v28 = vsel %vm174_vm5, %v325_v18, 0.0 }
  0x43   :  { %v88_v8 = vrot.slane %v83_v9, %v87_v1  ;;  %v114_v26 = vmul.f32 %v428_v16, %v113_v22  ;;  %v184_v34 = vadd.f32 %v175_v28, %v171_v27 }
  0x44   :  { %v156_v25 = vrot.slane %v151_v21, %v87_v1  ;;  %v430_v29 = vpop.eup %429 }
  0x45   :  { %v90_v20 = vmul.f32 %v88_v8, %v55_v11  ;;  %v115_v13 = vsel %vm108_vm4, %v114_v26, 0.0  ;;  %v181_v33 = vmul.f32 4.0, %v430_v29 }
  0x46   :  { %v158_v30 = vmul.f32 %v156_v25, %v55_v11  ;;  %v117_v32 = vadd.f32 %v116_v23, %v115_v13 }
  0x47   :  { %378 = vmatprep.mubr.f32.mxu0 %v90_v20  ;;  %v182_v36 = vmul.f32 %v430_v29, %v181_v33 }
  0x48   :  { %381 = vmatprep.mubr.f32.mxu1 %v158_v30  ;;  %v122_v35 = vrot.slane %v117_v32, %v87_v1 }
  0x49   :  { %v183_v38 = vsel %vm176_vm9, %v182_v36, 0.0 }
  0x4a   :  { %v124_v37 = vmul.f32 %v122_v35, %v55_v11  ;;  %v185_v39 = vadd.f32 %v184_v34, %v183_v38 }
  0x4c   :  { %379 = vmatmul.mubr.f32.vlgmr.msra.gmra.mxu0 %v124_v37  ;;  %v190_v40 = vrot.slane %v185_v39, %v87_v1 }
  0x4e   :  { %v192_v41 = vmul.f32 %v190_v40, %v55_v11 }
  0x50   :  { %382 = vmatmul.mubr.f32.vlgmr.msra.gmra.mxu1 %v192_v41 }
 0x10c   :  { %v380_v42 = vpop.f32.mrf.mxu0 }
 0x10d   :  { %295 = vst [vmem:[#allocation9 + $0x8] sm:$0xff] %v380_v42 }
 0x10e   :  { %v275_v43 = vpop.f32.mrf.mxu0 }
 0x10f   :  { %294 = vst [vmem:[#allocation9] sm:$0xff] %v275_v43 }
 0x110   :  { %v383_v24 = vpop.f32.mrf.mxu1 }
 0x111   :  { %297 = vst [vmem:[#allocation9 + $0x18] sm:$0xff] %v383_v24 }
 0x112   :  { %v285_v44 = vpop.f32.mrf.mxu1 }
 0x113   :  { %296 = vst [vmem:[#allocation9 + $0x10] sm:$0xff] %v285_v44 }
 0x114   :  { %490 = shalt.err (!%p487_p0)
}
 0x115   :  { %307 = dma.vmem_to_hbm [thread:$0]  %s305_s12, 512, %s669_s4, [#allocation4]  }
 0x116   :  { %505 = dma.done.wait [#allocation4], 512  }
 0x117   :  { %506 = vsyncadd [#allocation4], 4294966784 }
 0x118   :  { %311 = vsyncpa [#allocation3], 1 }
 0x119   :  { %312 = vsyncpa [#allocation8], 1 }
 0x11a   :  { %313 = vsyncpa [#allocation4], 1 }
 0x11b   :  { %314 = vsyncpa [#allocation5], 1 }

</bundles_post_ra>
